<compile_context>
chip_gen: v7x
topology: tpu7x:2x2x1
jax: 0.10.0
libtpu: 0.0.40
codegen_flags: <defaults>
</compile_context>

<pallas_src>
import functools

import jax
import jax.numpy as jnp
from jax.experimental import pallas as pl
from jax.experimental.pallas import tpu as pltpu

LANES = 128              # vreg lane width; minor dim of the streaming slab
TILE_ROWS = 2048         # (2048, 128) f32 tile = 1 MiB / input / buffer
NUM_CORES = 2            # leading "parallel" grid axis -> both TCs on v7x
_SMALL_ROWS = TILE_ROWS  # single-block fast-path threshold (rows)
_VMEM_LIMIT = 32 * 1024 * 1024


def _silog_small_kernel(pred_ref, targ_ref, out_ref):
    """Single-block path: whole [R,128] slab in VMEM, scalar sums to SMEM."""
    t = targ_ref[...].astype(jnp.float32)
    p = pred_ref[...].astype(jnp.float32)
    mask = t > 0.0
    # log of masked-out lanes may be nan/-inf; the select discards it.
    d = jnp.where(mask, jnp.log(t) - jnp.log(p), 0.0)
    out_ref[0] = jnp.sum(d)
    out_ref[1] = jnp.sum(d * d)
    out_ref[2] = jnp.sum(mask.astype(jnp.float32))


def _silog_tiled_kernel(pred_ref, targ_ref, out_ref, *,
                        tile_rows, tiles_per_core, valid_rows, use_row_mask):
    """Tiled path: per-core lane-resident partial sums.

    out_ref : (1, 3, 1, LANES) f32 block whose index_map is constant along the
              inner grid axis -> stays resident in VMEM and acts as the
              accumulator ([sum_d, sum_d2, count] kept per-lane).
    """
    c = pl.program_id(0)   # core slice ("parallel")
    i = pl.program_id(1)   # row-tile within the core slice ("arbitrary")

    @pl.when(i == 0)
    def _():
        out_ref[...] = jnp.zeros_like(out_ref)

    t = targ_ref[...].astype(jnp.float32)
    p = pred_ref[...].astype(jnp.float32)
    mask = t > 0.0

    if use_row_mask:
        # Logical (unclamped) tile index -> first global row of this tile.
        tile_idx = c * tiles_per_core + i
        rows_left = valid_rows - tile_idx * tile_rows
        row_ids = jax.lax.broadcasted_iota(jnp.int32, (tile_rows, LANES), 0)
        mask = jnp.logical_and(mask, row_ids < rows_left)

    # Masked-out / garbage lanes may produce nan/inf inside log; discarded by
    # the select (forward-only kernel).
    d = jnp.where(mask, jnp.log(t) - jnp.log(p), 0.0)

    # Reduce only down to (1, LANES) per step (VPU adds + one sublane reduce);
    # the expensive cross-lane reduce to scalars happens once, outside.
    out_ref[0, 0] += jnp.sum(d, axis=0, keepdims=True)
    out_ref[0, 1] += jnp.sum(d * d, axis=0, keepdims=True)
    out_ref[0, 2] += jnp.sum(mask.astype(jnp.float32), axis=0, keepdims=True)


@functools.partial(jax.jit, static_argnames=("lambd",))
def silog_loss(pred, target, valid_mask=None, lambd=0.5):
    """Pallas-backed SiLogLoss forward. valid_mask defaults to target > 0."""
    if valid_mask is not None:
        # TODO(synk): torch propagates nan for valid_mask entries whose target
        # is <= 0; here such entries are simply excluded from the loss.
        target = jnp.where(valid_mask, target, jnp.zeros_like(target))

    pred_f = pred.reshape(-1)     # keep native dtype; upcast inside the kernel
    targ_f = target.reshape(-1)
    n = pred_f.shape[0]

    rows = pl.cdiv(n, LANES)
    n_lane = rows * LANES
    if n_lane != n:
        # Only lane-alignment padding (< 128 elems). target pads with 0 so the
        # valid mask drops it; pred pads with 1 (value unused).
        pad = n_lane - n
        pred_f = jnp.concatenate([pred_f, jnp.ones((pad,), pred_f.dtype)])
        targ_f = jnp.concatenate([targ_f, jnp.zeros((pad,), targ_f.dtype)])

    pred2d = pred_f.reshape(rows, LANES)
    targ2d = targ_f.reshape(rows, LANES)

    if rows <= _SMALL_ROWS:
        # Single-block fast path.
        sums = pl.pallas_call(
            _silog_small_kernel,
            out_shape=jax.ShapeDtypeStruct((3,), jnp.float32),
            grid_spec=pltpu.PrefetchScalarGridSpec(
                num_scalar_prefetch=0,
                grid=(1,),
                in_specs=[pl.BlockSpec((rows, LANES), lambda i: (0, 0)),
                          pl.BlockSpec((rows, LANES), lambda i: (0, 0))],
                out_specs=pl.BlockSpec(memory_space=pltpu.SMEM)),
            compiler_params=pltpu.CompilerParams(
                dimension_semantics=("arbitrary",),
                vmem_limit_bytes=_VMEM_LIMIT),
        )(pred2d, targ2d)
        sum_d, sum_d2, count = sums[0], sums[1], sums[2]
    else:
        n_tiles = pl.cdiv(rows, TILE_ROWS)
        tiles_per_core = pl.cdiv(n_tiles, NUM_CORES)
        # Row masking is only traced in when some tile is partial / replicated.
        use_row_mask = (NUM_CORES * tiles_per_core * TILE_ROWS) != rows

        def in_map(c, i):
            # Clamp so the DMA never starts past the array; logically
            # out-of-range tiles contribute zero via the in-kernel row mask.
            return (jnp.minimum(c * tiles_per_core + i, n_tiles - 1), 0)

        kernel = functools.partial(
            _silog_tiled_kernel,
            tile_rows=TILE_ROWS,
            tiles_per_core=tiles_per_core,
            valid_rows=rows,
            use_row_mask=use_row_mask)

        partials = pl.pallas_call(
            kernel,
            out_shape=jax.ShapeDtypeStruct((NUM_CORES, 3, 1, LANES),
                                           jnp.float32),
            grid_spec=pltpu.PrefetchScalarGridSpec(
                num_scalar_prefetch=0,
                grid=(NUM_CORES, tiles_per_core),
                in_specs=[pl.BlockSpec((TILE_ROWS, LANES), in_map),
                          pl.BlockSpec((TILE_ROWS, LANES), in_map)],
                out_specs=pl.BlockSpec((1, 3, 1, LANES),
                                       lambda c, i: (c, 0, 0, 0))),
            compiler_params=pltpu.CompilerParams(
                dimension_semantics=("parallel", "arbitrary"),
                vmem_limit_bytes=_VMEM_LIMIT),
        )(pred2d, targ2d)
        sums = jnp.sum(partials, axis=(0, 2, 3))
        sum_d, sum_d2, count = sums[0], sums[1], sums[2]

    # count == 0 -> nan and no clamp before sqrt: both match torch.
    mean_d = sum_d / count
    mean_d2 = sum_d2 / count
    return jnp.sqrt(mean_d2 - lambd * mean_d * mean_d)


def _silog_loss_ref(pred, target, lambd=0.5):
    pred = pred.astype(jnp.float32).reshape(-1)
    target = target.astype(jnp.float32).reshape(-1)
    mask = target > 0.0
    d = jnp.where(mask,
                  jnp.log(jnp.where(mask, target, 1.0))
                  - jnp.log(jnp.where(mask, pred, 1.0)),
                  0.0)
    cnt = jnp.sum(mask.astype(jnp.float32))
    mean_d = jnp.sum(d) / cnt
    mean_d2 = jnp.sum(d * d) / cnt
    return jnp.sqrt(mean_d2 - lambd * mean_d * mean_d)


if __name__ == "__main__":
    key = jax.random.PRNGKey(0)

    def make_inputs(k, shape):
        k1, k2, k3 = jax.random.split(k, 3)
        pred = jax.random.uniform(k1, shape, jnp.float32, minval=0.1, maxval=10.0)
        target = jax.random.uniform(k2, shape, jnp.float32, minval=0.1, maxval=10.0)
        drop = jax.random.uniform(k3, shape) < 0.2
        target = jnp.where(drop, 0.0, target)   # zeros exercise the valid mask
        return pred, target

    k_small, k_big = jax.random.split(key)

    # Primary small demo (NCHW [2,4,16,16]) -> single-block fast path.
    pred, target = make_inputs(k_small, (2, 4, 16, 16))
    loss = silog_loss(pred, target, lambd=0.5)
    jax.block_until_ready(loss)
    ref = _silog_loss_ref(pred, target, lambd=0.5)
    assert jnp.allclose(loss, ref, rtol=1e-5, atol=1e-6), (loss, ref)

    # Secondary check: exercises the tiled 2-core path, the partial tail tile
    # and the clamped out-of-range tile on the second core.
    pred_b, target_b = make_inputs(k_big, (2, 5, 256, 256))
    loss_b = silog_loss(pred_b, target_b, lambd=0.5)
    jax.block_until_ready(loss_b)
    ref_b = _silog_loss_ref(pred_b, target_b, lambd=0.5)
    assert jnp.allclose(loss_b, ref_b, rtol=1e-4, atol=1e-6), (loss_b, ref_b)

    print("KERNEL_OK")
</pallas_src>

<mosaic_0001>
module attributes {stable_mosaic.version = 11 : i64} {
  func.func @_silog_small_kernel(%arg0: i32, %arg1: memref<16x128xf32, #tpu.memory_space<vmem>>, %arg2: memref<16x128xf32, #tpu.memory_space<vmem>>, %arg3: memref<3xf32, #tpu.memory_space<smem>>) attributes {dimension_semantics = [#tpu.dimension_semantics<arbitrary>], iteration_bounds = array<i64: 1>, scalar_prefetch = 0 : i64, scratch_operands = 0 : i64, tpu.core_type = #tpu.core_type<tc>, window_params = [{pipeline_mode = #tpu.pipeline_mode<synchronous>, transform_indices = @transform_0, window_bounds = array<i64: 16, 128>}, {pipeline_mode = #tpu.pipeline_mode<synchronous>, transform_indices = @transform_1, window_bounds = array<i64: 16, 128>}, {transform_indices = @transform_2, window_bounds = array<i64: 3>}]} {
    %c0 = arith.constant 0 : index
    %c0_0 = arith.constant 0 : index
    %0 = vector.load %arg2[%c0, %c0_0] : memref<16x128xf32, #tpu.memory_space<vmem>>, vector<16x128xf32>
    %c0_1 = arith.constant 0 : index
    %c0_2 = arith.constant 0 : index
    %1 = vector.load %arg1[%c0_1, %c0_2] : memref<16x128xf32, #tpu.memory_space<vmem>>, vector<16x128xf32>
    %cst = arith.constant 0.000000e+00 : f32
    %2 = vector.broadcast %cst : f32 to vector<16x128xf32>
    %3 = arith.cmpf ogt, %0, %2 : vector<16x128xf32>
    %4 = math.log %0 : vector<16x128xf32>
    %5 = math.log %1 : vector<16x128xf32>
    %6 = arith.subf %4, %5 : vector<16x128xf32>
    %cst_3 = arith.constant 0.000000e+00 : f32
    %7 = vector.broadcast %cst_3 : f32 to vector<16x128xf32>
    %8 = arith.select %3, %6, %7 : vector<16x128xi1>, vector<16x128xf32>
    %9 = vector.shape_cast %8 : vector<16x128xf32> to vector<1x16x128xf32>
    %cst_4 = arith.constant dense<0.000000e+00> : vector<1xf32>
    %10 = vector.multi_reduction <add>, %9, %cst_4 [1, 2] : vector<1x16x128xf32> to vector<1xf32>
    %11 = vector.shape_cast %10 : vector<1xf32> to vector<1x1x1xf32>
    %12 = vector.extract %11[0, 0, 0] : f32 from vector<1x1x1xf32>
    %c0_5 = arith.constant 0 : index
    %13 = memref.load %arg3[%c0_5] : memref<3xf32, #tpu.memory_space<smem>>
    memref.store %12, %arg3[%c0_5] : memref<3xf32, #tpu.memory_space<smem>>
    %14 = arith.mulf %8, %8 : vector<16x128xf32>
    %15 = vector.shape_cast %14 : vector<16x128xf32> to vector<1x16x128xf32>
    %cst_6 = arith.constant dense<0.000000e+00> : vector<1xf32>
    %16 = vector.multi_reduction <add>, %15, %cst_6 [1, 2] : vector<1x16x128xf32> to vector<1xf32>
    %17 = vector.shape_cast %16 : vector<1xf32> to vector<1x1x1xf32>
    %18 = vector.extract %17[0, 0, 0] : f32 from vector<1x1x1xf32>
    %c1 = arith.constant 1 : index
    %19 = memref.load %arg3[%c1] : memref<3xf32, #tpu.memory_space<smem>>
    memref.store %18, %arg3[%c1] : memref<3xf32, #tpu.memory_space<smem>>
    %20 = arith.extui %3 : vector<16x128xi1> to vector<16x128xi32>
    %21 = arith.sitofp %20 : vector<16x128xi32> to vector<16x128xf32>
    %22 = vector.shape_cast %21 : vector<16x128xf32> to vector<1x16x128xf32>
    %cst_7 = arith.constant dense<0.000000e+00> : vector<1xf32>
    %23 = vector.multi_reduction <add>, %22, %cst_7 [1, 2] : vector<1x16x128xf32> to vector<1xf32>
    %24 = vector.shape_cast %23 : vector<1xf32> to vector<1x1x1xf32>
    %25 = vector.extract %24[0, 0, 0] : f32 from vector<1x1x1xf32>
    %c2 = arith.constant 2 : index
    %26 = memref.load %arg3[%c2] : memref<3xf32, #tpu.memory_space<smem>>
    memref.store %25, %arg3[%c2] : memref<3xf32, #tpu.memory_space<smem>>
    return
  }
  func.func @transform_0(%arg0: i32) -> (i32, i32) {
    %c0_i32 = arith.constant 0 : i32
    %c0_i32_0 = arith.constant 0 : i32
    %c0_i32_1 = arith.constant 0 : i32
    return %c0_i32, %c0_i32_0 : i32, i32
  }
  func.func @transform_1(%arg0: i32) -> (i32, i32) {
    %c0_i32 = arith.constant 0 : i32
    %c0_i32_0 = arith.constant 0 : i32
    %c0_i32_1 = arith.constant 0 : i32
    return %c0_i32, %c0_i32_0 : i32, i32
  }
  func.func @transform_2(%arg0: i32) -> i32 {
    %c0_i32 = arith.constant 0 : i32
    %c0_i32_0 = arith.constant 0 : i32
    return %c0_i32 : i32
  }
}

</mosaic_0001>

<bundles_post_ra>
// kernel: silog_loss.1
= control target key start
LH: loop header
LB: loop body
LE: loop exit
PB: predicated region body
PF: predicated region fallthrough
CT: control target
= control target key end

     0   :  { %s155_s0 = inlined_call_operand.vmem [shape: f32[16,128], index: 0, kind: input, shape index: {}]   ;;  %s156_s1 = inlined_call_operand.vmem [shape: f32[16,128], index: 1, kind: input, shape index: {}]   ;;  %s157_s2 = inlined_call_operand.vmem [shape: f32[3], index: 2, kind: output, shape index: {}]  }
   0x1   :  { %v12_v0 = vld [vmem:[%s156_s1] sm:$0xff]  ;;  %v13_v1 = vld [vmem:[%s156_s1 + $0x8] sm:$0xff] }
   0x2   :  { %v14_v2 = vld [vmem:[%s155_s0] sm:$0xff]  ;;  %vm16_vm0 = vcmp.gt.f32.partialorder %v12_v0, 0.0  ;;  %vm17_vm1 = vcmp.gt.f32.partialorder %v13_v1, 0.0  ;;  %97 = vlog2.f32 %v12_v0  ;;  %v15_v3 = vld [vmem:[%s155_s0 + $0x8] sm:$0xff] }
   0x3   :  { %7 = vsyncpa [#allocation3], 0  ;;  %99 = vlog2.f32 %v13_v1  ;;  %v119_v4 = vmov 0.0   ;;  %s78_s18 = sshll.u32 %s157_s2, 4  ;;  %s79_s18 = int_to_ptr.vmem [resolvable:$true] %s78_s18 }
   0x4   :  { %v87_v5 = vsel %vm16_vm0, 1.0, %v119_v4  ;;  %v88_v6 = vsel %vm17_vm1, 1.0, %v119_v4  ;;  %101 = vlog2.f32 %v14_v2  ;;  %s105_s21 = scalar_lea.vmem %s79_s18, 16  ;;  %p110_p1 = scmp.lt.s32.totalorder %s79_s18, %s79_s18 }
   0x5   :  { %v60_v7 = vadd.f32 %v88_v6, %v87_v5  ;;  %103 = vlog2.f32 %v15_v3  ;;  %p106_p0 = scmp.ne.s32.totalorder %s79_s18, %s105_s21  ;;  %p111_p2 = scmp.lt.s32.totalorder %s105_s21, %s105_s21 }
   0x7   :  { %61 = vadd.xlane.f32.xlu1 %v60_v7  ;;  %p112_p3 = por %p111_p2, %p110_p1 }
   0x9   :  { %p113_p4 = pnand %p112_p3, %p106_p0 }
   0xc   :  { %v98_v8 = vpop.eup %97 }
   0xd   :  { %v100_v9 = vpop.eup %99  ;;  %v19_v10 = vmul.f32 0.6931472, %v98_v8 }
   0xe   :  { %v102_v11 = vpop.eup %101  ;;  %v21_v12 = vmul.f32 0.6931472, %v100_v9 }
   0xf   :  { %v104_v13 = vpop.eup %103  ;;  %v23_v14 = vmul.f32 0.6931472, %v102_v11 }
  0x10   :  { %v25_v15 = vmul.f32 0.6931472, %v104_v13 }
  0x11   :  { %v26_v16 = vsub.f32 %v19_v10, %v23_v14 }
  0x12   :  { %v27_v17 = vsub.f32 %v21_v12, %v25_v15 }
  0x13   :  { %v28_v18 = vsel %vm16_vm0, %v26_v16, 0.0 }
  0x14   :  { %v29_v19 = vsel %vm17_vm1, %v27_v17, 0.0  ;;  %v42_v20 = vmul.f32 %v28_v18, %v28_v18 }
  0x15   :  { %v30_v21 = vadd.f32 %v29_v19, %v28_v18  ;;  %v43_v22 = vmul.f32 %v29_v19, %v29_v19 }
  0x17   :  { %31 = vadd.xlane.f32.xlu0 %v30_v21  ;;  %v44_v23 = vadd.f32 %v43_v22, %v42_v20 }
  0x1b   :  { %45 = vadd.xlane.f32.xlu0 %v44_v23 }
  0x94   :  { %v62_v24 = vpop.xlane.xlu1 %61 }
  0x95   :  { %v63_v25 = vrot.slane %v62_v24, 4 }
  0x97   :  { %v64_v26 = vadd.f32 %v63_v25, %v62_v24 }
  0x99   :  { %v65_v30 = vrot.slane %v64_v26, 2 }
  0x9b   :  { %v66_v36 = vadd.f32 %v65_v30, %v64_v26 }
  0x9d   :  { %v67_v41 = vrot.slane %v66_v36, 1 }
  0x9f   :  { %v68_v44 = vadd.f32 %v67_v41, %v66_v36 }
  0xa4   :  { %v32_v27 = vpop.xlane.xlu0 %31 }
  0xa5   :  { %v33_v28 = vrot.slane %v32_v27, 4 }
  0xa7   :  { %v34_v29 = vadd.f32 %v33_v28, %v32_v27 }
  0xa8   :  { %v46_v31 = vpop.xlane.xlu0 %45 }
  0xa9   :  { %v35_v32 = vrot.slane %v34_v29, 2  ;;  %v47_v33 = vrot.slane %v46_v31, 4 }
  0xab   :  { %v48_v34 = vadd.f32 %v47_v33, %v46_v31  ;;  %v36_v35 = vadd.f32 %v35_v32, %v34_v29 }
  0xad   :  { %v49_v37 = vrot.slane %v48_v34, 2  ;;  %v37_v38 = vrot.slane %v36_v35, 1 }
  0xaf   :  { %v50_v39 = vadd.f32 %v49_v37, %v48_v34  ;;  %v38_v40 = vadd.f32 %v37_v38, %v36_v35 }
  0xb1   :  { %89 = vpush %v38_v40  ;;  %v51_v42 = vrot.slane %v50_v39, 1 }
  0xb3   :  { %v52_v43 = vadd.f32 %v51_v42, %v50_v39 }
  0xb5   :  { %91 = vpush %v52_v43 }
  0xb6   :  { %93 = vpush %v68_v44 }
  0xe2   :  { %s90_s0 = spop %89 }
  0xe3   :  { %41 = sst [smem:[#allocation2]] %s90_s0 }
  0xe6   :  { %s92_s19 = spop %91 }
  0xe7   :  { %55 = sst [smem:[#allocation2 + $0x1]] %s92_s19  ;;  %s94_s20 = spop %93 }
  0xe8   :  { %71 = sst [smem:[#allocation2 + $0x2]] %s94_s20 }
  0xe9   :  { %116 = shalt.err (!%p113_p4)
}
  0xea   :  { %s120_s22 = smov [#allocation2]  }
  0xeb   :  { %81 = dma.smem_to_vmem %s120_s22, 16, %s79_s18, [#allocation3]  }
  0xec   :  { %117 = dma.done.wait [#allocation3], 16  }
  0xed   :  { %118 = vsyncadd [#allocation3], 4294967280 }
  0xee   :  { %85 = sfence }
  0xef   :  { %86 = vsyncpa [#allocation3], 1 }

</bundles_post_ra>
